<compile_context>
chip_gen: v7x
topology: tpu7x:2x2x1
jax: 0.10.0
libtpu: 0.0.40
codegen_flags: <defaults>
</compile_context>

<pallas_src>
import jax
import jax.numpy as jnp
from jax.experimental import pallas as pl
from jax.experimental.pallas import tpu as pltpu

_LANE = 128  # lane width of a vreg; batch tiles are multiples of this


def mlp_kernel(x_ref, w1_ref, b1_ref, w2_ref, b2_ref, w3_ref, b3_ref, o_ref):
    # Transposed layout: x is (7, TILE_B), output is (5, TILE_B).
    x = x_ref[...]                                                  # (7, TB)

    # fc1 + ReLU
    h1 = jnp.dot(w1_ref[...], x, preferred_element_type=jnp.float32)
    h1 = jnp.maximum(h1 + b1_ref[...], 0.0)                         # (16, TB)

    # fc2 + ReLU
    h2 = jnp.dot(w2_ref[...], h1, preferred_element_type=jnp.float32)
    h2 = jnp.maximum(h2 + b2_ref[...], 0.0)                         # (32, TB)

    # fc3 (no activation)
    out = jnp.dot(w3_ref[...], h2, preferred_element_type=jnp.float32)
    out = out + b3_ref[...]                                         # (5, TB)

    o_ref[...] = out.astype(o_ref.dtype)


def _round_up(n, m):
    return ((n + m - 1) // m) * m


def neural_net_forward(x, params, *, tile_b=1024, min_pallas_batch=0):
    """Forward pass of NeuralNet.  x: (B, 7) float32  ->  (B, 5) float32.

    tile_b: batch tile (rounded down to the padded batch if smaller).
    min_pallas_batch: below this batch size fall back to pure JAX (the
    three tiny fused dots beat any hand kernel at toy batch sizes).
    """
    B = x.shape[0]
    if B < min_pallas_batch:
        return reference_forward(x, params)

    w1, b1 = params["w1"], params["b1"]
    w2, b2 = params["w2"], params["b2"]
    w3, b3 = params["w3"], params["b3"]
    in_f = w1.shape[1]     # 7
    out_f = w3.shape[0]    # 5

    # Put batch on the lane axis: pad B to a lane-aligned tile multiple.
    padded_b = _round_up(B, _LANE)
    tb = min(tile_b, padded_b)
    padded_b = _round_up(padded_b, tb)

    # Layout plumbing in the wrapper: present a lane-dense (features, B) slab.
    xt = jnp.zeros((in_f, padded_b), x.dtype).at[:, :B].set(x.T)

    grid = (padded_b // tb,)

    batch_map = lambda i: (0, i)   # tile over batch (lane axis)
    const_map = lambda i: (0, 0)   # weights/biases stay resident

    out_t = pl.pallas_call(
        mlp_kernel,
        out_shape=jax.ShapeDtypeStruct((out_f, padded_b), jnp.float32),
        grid=grid,
        in_specs=[
            pl.BlockSpec((in_f, tb), batch_map),      # x tile   (7, TB)
            pl.BlockSpec(w1.shape, const_map),        # W1       (16, 7)
            pl.BlockSpec(b1.shape, const_map),        # b1       (16, 1)
            pl.BlockSpec(w2.shape, const_map),        # W2       (32, 16)
            pl.BlockSpec(b2.shape, const_map),        # b2       (32, 1)
            pl.BlockSpec(w3.shape, const_map),        # W3       (5, 32)
            pl.BlockSpec(b3.shape, const_map),        # b3       (5, 1)
        ],
        out_specs=pl.BlockSpec((out_f, tb), batch_map),
        compiler_params=pltpu.CompilerParams(
            dimension_semantics=("parallel",),        # shards grid across TCs on v7x
            vmem_limit_bytes=64 * 1024 * 1024,        # explicit; tiles are tiny, safe on v7x 64 MiB VMEM
        ),
    )(xt, w1, b1, w2, b2, w3, b3)

    # Back to the PyTorch-facing (B, 5) layout, dropping batch padding.
    return out_t[:, :B].T


def init_params(key):
    """Deterministic init mimicking nn.Linear's U(-1/sqrt(fan_in), 1/sqrt(fan_in)).

    Weights are stored in PyTorch layout (out_features, in_features); biases
    as (out_features, 1) so the kernel broadcasts over the lane (batch) axis.
    A PyTorch state_dict maps directly: w = weight, b = bias[:, None].
    """
    def linear(key, fan_in, fan_out):
        kw, kb = jax.random.split(key)
        bound = 1.0 / jnp.sqrt(jnp.float32(fan_in))
        w = jax.random.uniform(kw, (fan_out, fan_in), jnp.float32, -bound, bound)
        b = jax.random.uniform(kb, (fan_out, 1), jnp.float32, -bound, bound)
        return w, b

    k1, k2, k3 = jax.random.split(key, 3)
    w1, b1 = linear(k1, 7, 16)
    w2, b2 = linear(k2, 16, 32)
    w3, b3 = linear(k3, 32, 5)
    return {"w1": w1, "b1": b1, "w2": w2, "b2": b2, "w3": w3, "b3": b3}


def reference_forward(x, params):
    """Pure-JAX reference (identical math to the PyTorch module)."""
    h1 = jnp.maximum(x @ params["w1"].T + params["b1"][:, 0], 0.0)
    h2 = jnp.maximum(h1 @ params["w2"].T + params["b2"][:, 0], 0.0)
    return h2 @ params["w3"].T + params["b3"][:, 0]


if __name__ == "__main__":
    key = jax.random.PRNGKey(0)
    k_params, k_x1, k_x2 = jax.random.split(key, 3)

    params = init_params(k_params)

    # Small-batch case (B=8, features=7) — forces the Pallas path.
    x_small = jax.random.normal(k_x1, (8, 7), jnp.float32)
    out_small = jax.block_until_ready(neural_net_forward(x_small, params))
    ref_small = reference_forward(x_small, params)
    assert out_small.shape == (8, 5)
    assert jnp.allclose(out_small, ref_small, atol=1e-5, rtol=1e-5), \
        "small-batch mismatch vs reference"

    # Multi-tile case to exercise the batch grid (3 tiles of 128).
    x_big = jax.random.normal(k_x2, (300, 7), jnp.float32)
    out_big = jax.block_until_ready(
        neural_net_forward(x_big, params, tile_b=128))
    ref_big = reference_forward(x_big, params)
    assert out_big.shape == (300, 5)
    assert jnp.allclose(out_big, ref_big, atol=1e-5, rtol=1e-5), \
        "tiled-batch mismatch vs reference"

    print("KERNEL_OK")
</pallas_src>

<mosaic_0001>
module attributes {stable_mosaic.version = 11 : i64} {
  func.func @mlp_kernel(%arg0: i32, %arg1: memref<7x128xf32, #tpu.memory_space<vmem>>, %arg2: memref<16x7xf32, #tpu.memory_space<vmem>>, %arg3: memref<16x1xf32, #tpu.memory_space<vmem>>, %arg4: memref<32x16xf32, #tpu.memory_space<vmem>>, %arg5: memref<32x1xf32, #tpu.memory_space<vmem>>, %arg6: memref<5x32xf32, #tpu.memory_space<vmem>>, %arg7: memref<5x1xf32, #tpu.memory_space<vmem>>, %arg8: memref<5x128xf32, #tpu.memory_space<vmem>>) attributes {dimension_semantics = [#tpu.dimension_semantics<parallel>], iteration_bounds = array<i64: 1>, scalar_prefetch = 0 : i64, scratch_operands = 0 : i64, tpu.core_type = #tpu.core_type<tc>, window_params = [{transform_indices = @transform_0, window_bounds = array<i64: 7, 128>}, {pipeline_mode = #tpu.pipeline_mode<synchronous>, transform_indices = @transform_1, window_bounds = array<i64: 16, 7>}, {pipeline_mode = #tpu.pipeline_mode<synchronous>, transform_indices = @transform_2, window_bounds = array<i64: 16, 1>}, {pipeline_mode = #tpu.pipeline_mode<synchronous>, transform_indices = @transform_3, window_bounds = array<i64: 32, 16>}, {pipeline_mode = #tpu.pipeline_mode<synchronous>, transform_indices = @transform_4, window_bounds = array<i64: 32, 1>}, {pipeline_mode = #tpu.pipeline_mode<synchronous>, transform_indices = @transform_5, window_bounds = array<i64: 5, 32>}, {pipeline_mode = #tpu.pipeline_mode<synchronous>, transform_indices = @transform_6, window_bounds = array<i64: 5, 1>}, {transform_indices = @transform_7, window_bounds = array<i64: 5, 128>}]} {
    %c0 = arith.constant 0 : index
    %c0_0 = arith.constant 0 : index
    %0 = vector.load %arg1[%c0, %c0_0] : memref<7x128xf32, #tpu.memory_space<vmem>>, vector<7x128xf32>
    %c0_1 = arith.constant 0 : index
    %c0_2 = arith.constant 0 : index
    %1 = vector.load %arg2[%c0_1, %c0_2] : memref<16x7xf32, #tpu.memory_space<vmem>>, vector<16x7xf32>
    %cst = arith.constant dense<0.000000e+00> : vector<16x128xf32>
    %2 = tpu.matmul %1, %0, %cst {dimension_numbers = #tpu.dot_dimension_numbers<[1], [0], [0], [1], [0, 0, 1, 1], [], []>} : vector<16x7xf32>, vector<7x128xf32>, vector<16x128xf32> -> vector<16x128xf32>
    %c0_3 = arith.constant 0 : index
    %c0_4 = arith.constant 0 : index
    %3 = vector.load %arg3[%c0_3, %c0_4] : memref<16x1xf32, #tpu.memory_space<vmem>>, vector<16x1xf32>
    %4 = vector.broadcast %3 : vector<16x1xf32> to vector<16x128xf32>
    %5 = arith.addf %2, %4 : vector<16x128xf32>
    %cst_5 = arith.constant 0.000000e+00 : f32
    %6 = vector.broadcast %cst_5 : f32 to vector<16x128xf32>
    %7 = arith.maximumf %5, %6 : vector<16x128xf32>
    %c0_6 = arith.constant 0 : index
    %c0_7 = arith.constant 0 : index
    %8 = vector.load %arg4[%c0_6, %c0_7] : memref<32x16xf32, #tpu.memory_space<vmem>>, vector<32x16xf32>
    %cst_8 = arith.constant dense<0.000000e+00> : vector<32x128xf32>
    %9 = tpu.matmul %8, %7, %cst_8 {dimension_numbers = #tpu.dot_dimension_numbers<[1], [0], [0], [1], [0, 0, 1, 1], [], []>} : vector<32x16xf32>, vector<16x128xf32>, vector<32x128xf32> -> vector<32x128xf32>
    %c0_9 = arith.constant 0 : index
    %c0_10 = arith.constant 0 : index
    %10 = vector.load %arg5[%c0_9, %c0_10] : memref<32x1xf32, #tpu.memory_space<vmem>>, vector<32x1xf32>
    %11 = vector.broadcast %10 : vector<32x1xf32> to vector<32x128xf32>
    %12 = arith.addf %9, %11 : vector<32x128xf32>
    %cst_11 = arith.constant 0.000000e+00 : f32
    %13 = vector.broadcast %cst_11 : f32 to vector<32x128xf32>
    %14 = arith.maximumf %12, %13 : vector<32x128xf32>
    %c0_12 = arith.constant 0 : index
    %c0_13 = arith.constant 0 : index
    %15 = vector.load %arg6[%c0_12, %c0_13] : memref<5x32xf32, #tpu.memory_space<vmem>>, vector<5x32xf32>
    %cst_14 = arith.constant dense<0.000000e+00> : vector<5x128xf32>
    %16 = tpu.matmul %15, %14, %cst_14 {dimension_numbers = #tpu.dot_dimension_numbers<[1], [0], [0], [1], [0, 0, 1, 1], [], []>} : vector<5x32xf32>, vector<32x128xf32>, vector<5x128xf32> -> vector<5x128xf32>
    %c0_15 = arith.constant 0 : index
    %c0_16 = arith.constant 0 : index
    %17 = vector.load %arg7[%c0_15, %c0_16] : memref<5x1xf32, #tpu.memory_space<vmem>>, vector<5x1xf32>
    %18 = vector.broadcast %17 : vector<5x1xf32> to vector<5x128xf32>
    %19 = arith.addf %16, %18 : vector<5x128xf32>
    %c0_17 = arith.constant 0 : index
    %c0_18 = arith.constant 0 : index
    %20 = vector.load %arg8[%c0_17, %c0_18] : memref<5x128xf32, #tpu.memory_space<vmem>>, vector<5x128xf32>
    tpu.vector_store %arg8[%c0_17, %c0_18], %19 {strides = array<i32>} : memref<5x128xf32, #tpu.memory_space<vmem>>, vector<5x128xf32>,
    return
  }
  func.func @transform_0(%arg0: i32) -> (i32, i32) {
    %c0_i32 = arith.constant 0 : i32
    %c0_i32_0 = arith.constant 0 : i32
    return %c0_i32, %arg0 : i32, i32
  }
  func.func @transform_1(%arg0: i32) -> (i32, i32) {
    %c0_i32 = arith.constant 0 : i32
    %c0_i32_0 = arith.constant 0 : i32
    %c0_i32_1 = arith.constant 0 : i32
    return %c0_i32, %c0_i32_0 : i32, i32
  }
  func.func @transform_2(%arg0: i32) -> (i32, i32) {
    %c0_i32 = arith.constant 0 : i32
    %c0_i32_0 = arith.constant 0 : i32
    %c0_i32_1 = arith.constant 0 : i32
    return %c0_i32, %c0_i32_0 : i32, i32
  }
  func.func @transform_3(%arg0: i32) -> (i32, i32) {
    %c0_i32 = arith.constant 0 : i32
    %c0_i32_0 = arith.constant 0 : i32
    %c0_i32_1 = arith.constant 0 : i32
    return %c0_i32, %c0_i32_0 : i32, i32
  }
  func.func @transform_4(%arg0: i32) -> (i32, i32) {
    %c0_i32 = arith.constant 0 : i32
    %c0_i32_0 = arith.constant 0 : i32
    %c0_i32_1 = arith.constant 0 : i32
    return %c0_i32, %c0_i32_0 : i32, i32
  }
  func.func @transform_5(%arg0: i32) -> (i32, i32) {
    %c0_i32 = arith.constant 0 : i32
    %c0_i32_0 = arith.constant 0 : i32
    %c0_i32_1 = arith.constant 0 : i32
    return %c0_i32, %c0_i32_0 : i32, i32
  }
  func.func @transform_6(%arg0: i32) -> (i32, i32) {
    %c0_i32 = arith.constant 0 : i32
    %c0_i32_0 = arith.constant 0 : i32
    %c0_i32_1 = arith.constant 0 : i32
    return %c0_i32, %c0_i32_0 : i32, i32
  }
  func.func @transform_7(%arg0: i32) -> (i32, i32) {
    %c0_i32 = arith.constant 0 : i32
    %c0_i32_0 = arith.constant 0 : i32
    return %c0_i32, %arg0 : i32, i32
  }
}

</mosaic_0001>

<bundles_post_ra>
// kernel: tpu_custom_call.1
= control target key start
LH: loop header
LB: loop body
LE: loop exit
PB: predicated region body
PF: predicated region fallthrough
CT: control target
= control target key end

     0   :  { %12 = vsyncpa [#allocation3], 0  ;;  %s875_s0 = inlined_call_operand.hbm [shape: f32[7,128], index: 0, kind: input, shape index: {}]   ;;  %s876_s1 = inlined_call_operand.hbm [shape: f32[16,7], index: 1, kind: input, shape index: {}]   ;;  %s877_s2 = inlined_call_operand.hbm [shape: f32[16,1], index: 2, kind: input, shape index: {}]   ;;  %s878_s3 = inlined_call_operand.hbm [shape: f32[32,16], index: 3, kind: input, shape index: {}]   ;;  %s879_s4 = inlined_call_operand.hbm [shape: f32[32,1], index: 4, kind: input, shape index: {}]   ;;  %s880_s5 = inlined_call_operand.hbm [shape: f32[5,32], index: 5, kind: input, shape index: {}]   ;;  %s881_s6 = inlined_call_operand.hbm [shape: f32[5,1], index: 6, kind: input, shape index: {}]   ;;  %s882_s7 = inlined_call_operand.hbm [shape: f32[5,128], index: 7, kind: output, shape index: {}]  }
   0x1   :  { %13 = vsyncpa [#allocation6], 0 }
   0x2   :  { %14 = vsyncpa [#allocation9], 0 }
   0x3   :  { %15 = vsyncpa [#allocation12], 0 }
   0x4   :  { %16 = vsyncpa [#allocation4], 0  ;;  %s709_s24 = smov [#allocation5]   ;;  %s523_s28 = scalar_lea.hbm %s876_s1, 256 }
   0x5   :  { %s32_s25 = sshll.u32 %s709_s24, 4  ;;  %p524_p0 = scmp.ne.s32.totalorder %s876_s1, %s523_s28  ;;  %s33_s25 = int_to_ptr.vmem [resolvable:$true] %s32_s25 }
   0x6   :  { %p527_p1 = scmp.lt.u32.totalorder %s523_s28, %s876_s1 }
   0x8   :  { %p529_p2 = pnand %p527_p1, %p524_p0 }
   0xa   :  { %532 = shalt.err (!%p529_p2)
}
   0xb   :  { %s533_s10 = scalar_lea.vmem %s33_s25, 256  ;;  %p538_p4 = scmp.lt.s32.totalorder %s33_s25, %s33_s25 }
   0xc   :  { %p534_p3 = scmp.ne.s32.totalorder %s33_s25, %s533_s10  ;;  %p539_p5 = scmp.lt.s32.totalorder %s533_s10, %s533_s10 }
   0xe   :  { %p540_p6 = por %p539_p5, %p538_p4 }
  0x10   :  { %p541_p7 = pnand %p540_p6, %p534_p3 }
  0x12   :  { %544 = shalt.err (!%p541_p7)
}
  0x13   :  { %s710_s11 = smov 128   ;;  %s711_s12 = smov 8  }
  0x14   :  { %38 = dma.hbm_to_vmem [thread:$0]  %s876_s1, 256, %s33_s25, [#allocation6], %s710_s11, %s710_s11, %s711_s12  }
  0x15   :  { %s712_s15 = smov [#allocation8]   ;;  %s713_s17 = smov [#allocation11]  }
  0x16   :  { %s56_s16 = sshll.u32 %s712_s15, 4  ;;  %s81_s18 = sshll.u32 %s713_s17, 4  ;;  %s57_s16 = int_to_ptr.vmem [resolvable:$true] %s56_s16  ;;  %s82_s18 = int_to_ptr.vmem [resolvable:$true] %s81_s18 }
  0x17   :  { %s545_s21 = scalar_lea.hbm %s878_s3, 512 }
  0x18   :  { %p546_p8 = scmp.ne.s32.totalorder %s878_s3, %s545_s21  ;;  %p549_p9 = scmp.lt.u32.totalorder %s545_s21, %s878_s3 }
  0x1a   :  { %p551_p10 = pnand %p549_p9, %p546_p8 }
  0x1c   :  { %554 = shalt.err (!%p551_p10)
}
  0x1d   :  { %s555_s1 = scalar_lea.vmem %s57_s16, 512  ;;  %p560_p12 = scmp.lt.s32.totalorder %s57_s16, %s57_s16 }
  0x1e   :  { %p556_p11 = scmp.ne.s32.totalorder %s57_s16, %s555_s1  ;;  %p561_p13 = scmp.lt.s32.totalorder %s555_s1, %s555_s1 }
  0x20   :  { %p562_p0 = por %p561_p13, %p560_p12 }
  0x22   :  { %p563_p1 = pnand %p562_p0, %p556_p11 }
  0x24   :  { %566 = shalt.err (!%p563_p1)
}
  0x25   :  { %62 = dma.hbm_to_vmem [thread:$0]  %s878_s3, 512, %s57_s16, [#allocation9], %s710_s11, %s710_s11, %s711_s12  }
  0x26   :  { %s567_s30 = scalar_lea.hbm %s880_s5, 128 }
  0x27   :  { %p568_p2 = scmp.ne.s32.totalorder %s880_s5, %s567_s30  ;;  %p571_p3 = scmp.lt.u32.totalorder %s567_s30, %s880_s5 }
  0x29   :  { %p573_p4 = pnand %p571_p3, %p568_p2 }
  0x2b   :  { %576 = shalt.err (!%p573_p4)
}
  0x2c   :  { %s577_s14 = scalar_lea.vmem %s82_s18, 128  ;;  %p582_p6 = scmp.lt.s32.totalorder %s82_s18, %s82_s18 }
  0x2d   :  { %p578_p5 = scmp.ne.s32.totalorder %s82_s18, %s577_s14  ;;  %p583_p7 = scmp.lt.s32.totalorder %s577_s14, %s577_s14 }
  0x2f   :  { %p584_p8 = por %p583_p7, %p582_p6 }
  0x31   :  { %p585_p9 = pnand %p584_p8, %p578_p5 }
  0x33   :  { %588 = shalt.err (!%p585_p9)
}
  0x34   :  { %84 = dma.hbm_to_vmem [thread:$0]  %s880_s5, 128, %s82_s18, [#allocation12]  }
  0x35   :  { %s714_s16 = smov [#allocation2]   ;;  %s715_s19 = smov [#allocation7]  }
  0x36   :  { %s23_s17 = sshll.u32 %s714_s16, 4  ;;  %s44_s20 = sshll.u32 %s715_s19, 4  ;;  %s24_s17 = int_to_ptr.vmem [resolvable:$true] %s23_s17  ;;  %s45_s20 = int_to_ptr.vmem [resolvable:$true] %s44_s20 }
  0x37   :  { %s589_s23 = scalar_lea.hbm %s875_s0, 128 }
  0x38   :  { %p590_p10 = scmp.ne.s32.totalorder %s875_s0, %s589_s23  ;;  %p593_p11 = scmp.lt.u32.totalorder %s589_s23, %s875_s0 }
  0x3a   :  { %p595_p12 = pnand %p593_p11, %p590_p10 }
  0x3c   :  { %598 = shalt.err (!%p595_p12)
}
  0x3d   :  { %s599_s5 = scalar_lea.vmem %s24_s17, 128  ;;  %p604_p0 = scmp.lt.s32.totalorder %s24_s17, %s24_s17 }
  0x3e   :  { %p600_p13 = scmp.ne.s32.totalorder %s24_s17, %s599_s5  ;;  %p605_p1 = scmp.lt.s32.totalorder %s599_s5, %s599_s5 }
  0x40   :  { %p606_p2 = por %p605_p1, %p604_p0 }
  0x42   :  { %p607_p3 = pnand %p606_p2, %p600_p13 }
  0x44   :  { %610 = shalt.err (!%p607_p3)
}
  0x45   :  { %26 = dma.hbm_to_vmem [thread:$0]  %s875_s0, 128, %s24_s17, [#allocation3]  }
  0x46   :  { %s611_s30 = scalar_lea.hbm %s877_s2, 256 }
  0x47   :  { %p612_p4 = scmp.ne.s32.totalorder %s877_s2, %s611_s30  ;;  %p615_p5 = scmp.lt.u32.totalorder %s611_s30, %s877_s2 }
  0x49   :  { %p617_p6 = pnand %p615_p5, %p612_p4 }
  0x4b   :  { %620 = shalt.err (!%p617_p6)
}
  0x4c   :  { %s621_s14 = scalar_lea.vmem %s45_s20, 256  ;;  %p626_p8 = scmp.lt.s32.totalorder %s45_s20, %s45_s20 }
  0x4d   :  { %p622_p7 = scmp.ne.s32.totalorder %s45_s20, %s621_s14  ;;  %p627_p9 = scmp.lt.s32.totalorder %s621_s14, %s621_s14 }
  0x4f   :  { %p628_p10 = por %p627_p9, %p626_p8 }
  0x51   :  { %p629_p11 = pnand %p628_p10, %p622_p7 }
  0x53   :  { %632 = shalt.err (!%p629_p11)
}
  0x54   :  { %50 = dma.hbm_to_vmem [thread:$0]  %s877_s2, 256, %s45_s20, [#allocation6], %s710_s11, %s710_s11, %s711_s12  }
  0x55   :  { %s716_s15 = smov [#allocation10]   ;;  %s717_s17 = smov [#allocation13]  }
  0x56   :  { %s68_s16 = sshll.u32 %s716_s15, 4  ;;  %s91_s19 = sshll.u32 %s717_s17, 4  ;;  %s69_s16 = int_to_ptr.vmem [resolvable:$true] %s68_s16  ;;  %s92_s19 = int_to_ptr.vmem [resolvable:$true] %s91_s19 }
  0x57   :  { %s633_s23 = scalar_lea.hbm %s879_s4, 512 }
  0x58   :  { %p634_p12 = scmp.ne.s32.totalorder %s879_s4, %s633_s23  ;;  %p637_p13 = scmp.lt.u32.totalorder %s633_s23, %s879_s4 }
  0x5a   :  { %p639_p0 = pnand %p637_p13, %p634_p12 }
  0x5c   :  { %642 = shalt.err (!%p639_p0)
}
  0x5d   :  { %s643_s2 = scalar_lea.vmem %s69_s16, 512  ;;  %p648_p2 = scmp.lt.s32.totalorder %s69_s16, %s69_s16 }
  0x5e   :  { %p644_p1 = scmp.ne.s32.totalorder %s69_s16, %s643_s2  ;;  %p649_p3 = scmp.lt.s32.totalorder %s643_s2, %s643_s2 }
  0x60   :  { %p650_p4 = por %p649_p3, %p648_p2 }
  0x62   :  { %p651_p5 = pnand %p650_p4, %p644_p1 }
  0x64   :  { %654 = shalt.err (!%p651_p5)
}
  0x65   :  { %74 = dma.hbm_to_vmem [thread:$0]  %s879_s4, 512, %s69_s16, [#allocation9], %s710_s11, %s710_s11, %s711_s12  }
  0x66   :  { %s655_s28 = scalar_lea.hbm %s881_s6, 128 }
  0x67   :  { %p656_p6 = scmp.ne.s32.totalorder %s881_s6, %s655_s28  ;;  %p659_p7 = scmp.lt.u32.totalorder %s655_s28, %s881_s6 }
  0x69   :  { %p661_p8 = pnand %p659_p7, %p656_p6 }
  0x6b   :  { %664 = shalt.err (!%p661_p8)
}
  0x6c   :  { %s665_s10 = scalar_lea.vmem %s92_s19, 128  ;;  %p670_p10 = scmp.lt.s32.totalorder %s92_s19, %s92_s19 }
  0x6d   :  { %p666_p9 = scmp.ne.s32.totalorder %s92_s19, %s665_s10  ;;  %p671_p11 = scmp.lt.s32.totalorder %s665_s10, %s665_s10 }
  0x6f   :  { %p672_p12 = por %p671_p11, %p670_p10 }
  0x71   :  { %p673_p13 = pnand %p672_p12, %p666_p9 }
  0x73   :  { %676 = shalt.err (!%p673_p13)
}
  0x74   :  { %94 = dma.hbm_to_vmem [thread:$0]  %s881_s6, 128, %s92_s19, [#allocation12]  }
  0x75   :  { %699 = dma.done.wait [#allocation3], 128  }
  0x76   :  { %700 = vsyncadd [#allocation3], 4294967168 }
  0x77   :  { %701 = dma.done.wait [#allocation6], 512  }
  0x78   :  { %702 = vsyncadd [#allocation6], 4294966784 }
  0x79   :  { %703 = dma.done.wait [#allocation9], 1024  }
  0x7a   :  { %704 = vsyncadd [#allocation9], 4294966272 }
  0x7b   :  { %705 = dma.done.wait [#allocation12], 256  }
  0x7c   :  { %706 = vsyncadd [#allocation12], 4294967040  ;;  %v718_v0 = vmov 0   ;;  %vm138_vm0 = vcmask 1046528   ;;  %vm131_vm1 = vcmask 56320   ;;  %v117_v2 = vld [vmem:[#allocation5] sm:$0xff] }
  0x7d   :  { %521 = vset.pattern.permute.xlu0 %v718_v0  ;;  %522 = vset.pattern.permute.xlu1 %v718_v0  ;;  %v116_v1 = vld [vmem:[#allocation2] sm:$0x7f]  ;;  %v118_v3 = vld [vmem:[#allocation5 + $0x8] sm:$0xff]  ;;  %v119_v4 = vld [vmem:[#allocation7] sm:$0xff]  ;;  %vm247_vm2 = vcmask 130048   ;;  %v719_v24 = vmov 0.0|0.0  }
  0x7e   :  { %471 = vmatprep.subr.msk.mxu0 %vm138_vm0, %v116_v1  ;;  %473 = vmatprep.mubr.msk.f32.mxu0 %vm131_vm1, %v117_v2  ;;  %v120_v5 = vld [vmem:[#allocation7 + $0x8] sm:$0xff]  ;;  %v225_v6 = vld [vmem:[#allocation10 + $0x10] sm:$0xff]  ;;  %v350_v7 = vld [vmem:[#allocation13] sm:$0x1f]  ;;  %vm720_vm3 = vmmov 0   ;;  %v721_v25 = vmov 0.0  }
  0x7f   :  { %472 = vmatpush3.msk.msra.mxu0 %vm138_vm0, %v116_v1  ;;  %123 = vperm.xlu0 %521, %v119_v4   ;;  %v219_v8 = vld [vmem:[#allocation8] sm:$0xff]  ;;  %v224_v10 = vld [vmem:[#allocation10 + $0x8] sm:$0xff]  ;;  %v226_v11 = vld [vmem:[#allocation10 + $0x18] sm:$0xff]  ;;  %vm356_vm4 = vcmask 261120   ;;  %s722_s6 = smov [#allocation14]  }
  0x80   :  { %474 = vmatmul.mubr.msk.f32.vlgmr.msra.gmra.mrb[0].mxu0 %vm131_vm1, %v118_v3  ;;  %480 = vmatprep.mubr.msk.f32.mxu1 %vm247_vm2, %v219_v8  ;;  %v223_v9 = vld [vmem:[#allocation10] sm:$0xff]  ;;  %v220_v21 = vld [vmem:[#allocation8 + $0x8] sm:$0xff]  ;;  %v221_v22 = vld [vmem:[#allocation8 + $0x10] sm:$0xff]  ;;  %s437_s12 = sshll.u32 %s722_s6, 4  ;;  %s438_s12 = int_to_ptr.vmem [resolvable:$true] %s437_s12 }
  0x81   :  { %229 = vperm.xlu1 %522, %v223_v9   ;;  %v222_v23 = vld [vmem:[#allocation8 + $0x18] sm:$0xff]  ;;  %501 = vmatprep.subr.bf16.mxu0 %v719_v24  ;;  %v349_v44 = vld [vmem:[#allocation11] sm:$0x1f]  ;;  %s677_s13 = scalar_lea.vmem %s438_s12, 128  ;;  %p682_p1 = scmp.lt.s32.totalorder %s438_s12, %s438_s12 }
  0x82   :  { %494 = vmatprep.mubr.msk.f32.mxu0 %vm720_vm3, %v721_v25  ;;  %p678_p0 = scmp.ne.s32.totalorder %s438_s12, %s677_s13  ;;  %p683_p2 = scmp.lt.s32.totalorder %s677_s13, %s677_s13 }
  0x83   :  { %128 = vperm.xlu0 %521, %v120_v5  }
  0x84   :  { %p684_p3 = por %p683_p2, %p682_p1 }
  0x85   :  { %234 = vperm.xlu1 %522, %v224_v10  }
  0x86   :  { %p685_p4 = pnand %p684_p3, %p678_p0 }
  0x87   :  { %239 = vperm.xlu0 %521, %v225_v6  }
  0x89   :  { %244 = vperm.xlu1 %522, %v226_v11  }
  0x8b   :  { %353 = vperm.xlu0 %521, %v350_v7  }
  0xfe   :  { %v124_v12 = vpop.permute.xlu0 %123 }
 0x100   :  { %v230_v26 = vpop.permute.xlu1 %229 }
 0x102   :  { %v129_v13 = vpop.permute.xlu0 %128 }
 0x104   :  { %v235_v27 = vpop.permute.xlu1 %234 }
 0x106   :  { %v240_v36 = vpop.permute.xlu0 %239 }
 0x108   :  { %v245_v33 = vpop.permute.xlu1 %244 }
 0x10a   :  { %v354_v45 = vpop.permute.xlu0 %353 }
 0x153   :  { %v475_v14 = vpop.f32.mrb[0].mxu0 }
 0x154   :  { %v214_v15 = vadd.f32 %v475_v14, %v129_v13  ;;  %v208_v16 = vpop.f32.mrb[1].mxu0 }
 0x155   :  { %v209_v17 = vadd.f32 %v208_v16, %v124_v12 }
 0x156   :  { %v218_v18 = vmax.f32 %v214_v15, 0.0 }
 0x157   :  { %v217_v19 = vmax.f32 %v209_v17, 0.0 }
 0x159   :  { %v497_v20 = vpack.c.bf16 %v218_v18, %v217_v19 }
 0x15b   :  { %498 = vmatprep.subr.bf16.mxu1 %v497_v20 }
 0x15c   :  { %500 = vmatpush3.bf16.msra.mxu1 %v497_v20 }
 0x15f   :  { %481 = vmatmul.mubr.msk.f32.vlgmr.msra.gmra.mrb[0].mxu1 %vm247_vm2, %v220_v21 }
 0x160   :  { %483 = vmatprep.mubr.msk.f32.mxu1 %vm247_vm2, %v221_v22 }
 0x163   :  { %484 = vmatmul.mubr.msk.f32.gmra.mrb[2].mxu1 %vm247_vm2, %v222_v23 }
 0x232   :  { %v482_v28 = vpop.f32.mrb[0].mxu1 }
 0x233   :  { %v332_v29 = vadd.f32 %v482_v28, %v235_v27  ;;  %v326_v30 = vpop.f32.mrb[1].mxu1 }
 0x234   :  { %v327_v31 = vadd.f32 %v326_v30, %v230_v26 }
 0x235   :  { %v346_v32 = vmax.f32 %v332_v29, 0.0 }
 0x236   :  { %v345_v34 = vmax.f32 %v327_v31, 0.0  ;;  %v485_v35 = vpop.f32.mrb[2].mxu1 }
 0x237   :  { %v342_v37 = vadd.f32 %v485_v35, %v245_v33  ;;  %v336_v38 = vpop.f32.mrb[3].mxu1 }
 0x238   :  { %v502_v39 = vpack.c.bf16 %v346_v32, %v345_v34  ;;  %v337_v40 = vadd.f32 %v336_v38, %v240_v36 }
 0x239   :  { %v348_v41 = vmax.f32 %v342_v37, 0.0 }
 0x23a   :  { %v347_v42 = vmax.f32 %v337_v40, 0.0  ;;  %503 = vmatpush3.bf16.msra.mxu0 %v502_v39 }
 0x23b   :  { %504 = vmatprep.subr.bf16.mxu0 %v719_v24 }
 0x23c   :  { %v505_v43 = vpack.c.bf16 %v348_v41, %v347_v42 }
 0x23e   :  { %506 = vmatpush3.bf16.msra.mxu0 %v505_v43 }
 0x241   :  { %495 = vmatmul.mubr.msk.f32.vlgmr.msra.gmra.mrb[2].mxu0 %vm356_vm4, %v349_v44 }
 0x314   :  { %v426_v46 = vpop.f32.mrb[2].mxu0 }
 0x315   :  { %v427_v47 = vadd.f32 %v426_v46, %v354_v45  ;;  %v496_v48 = vpop.f32.mrb[3].mxu0 }
 0x317   :  { %430 = vst [vmem:[#allocation14] sm:$0x1f] %v427_v47 }
 0x318   :  { %688 = shalt.err (!%p685_p4)
}
 0x319   :  { %s689_s3 = scalar_lea.hbm %s882_s7, 128 }
 0x31a   :  { %p690_p5 = scmp.ne.s32.totalorder %s882_s7, %s689_s3  ;;  %p693_p6 = scmp.lt.u32.totalorder %s689_s3, %s882_s7 }
 0x31c   :  { %p695_p7 = pnand %p693_p6, %p690_p5 }
 0x31e   :  { %698 = shalt.err (!%p695_p7)
}
 0x31f   :  { %440 = dma.vmem_to_hbm [thread:$0]  %s438_s12, 128, %s882_s7, [#allocation4]  }
 0x320   :  { %707 = dma.done.wait [#allocation4], 128  }
 0x321   :  { %708 = vsyncadd [#allocation4], 4294967168 }
 0x322   :  { %444 = vsyncpa [#allocation3], 1 }
 0x323   :  { %445 = vsyncpa [#allocation6], 1 }
 0x324   :  { %446 = vsyncpa [#allocation9], 1 }
 0x325   :  { %447 = vsyncpa [#allocation12], 1 }
 0x326   :  { %448 = vsyncpa [#allocation4], 1 }

</bundles_post_ra>
